<compile_context>
chip_gen: v6e
topology: v6e:2x2x1
jax: 0.10.0
libtpu: 0.0.40
codegen_flags: <defaults>
</compile_context>

<pallas_src>
import functools
import math

import jax
import jax.numpy as jnp
from jax.experimental import pallas as pl
from jax.experimental.pallas import tpu as pltpu

P = 128      # lane width; packed weight tiles are (P, P)
Y_OFF = 64   # lane offset of the genre branch inside the 128-lane output


def _ceil_to(n, m):
    return ((n + m - 1) // m) * m


# ---------------------------------------------------------------------------
# Kernel
# ---------------------------------------------------------------------------
def _double_embedding_kernel(x_ref, y_ref, w_ref, b_ref, wg_ref, out_ref):
    """x_ref  : (TB, d_in_p)   raw textual input rows
       y_ref  : (TB, d_out_p)  raw genre input rows
       w_ref  : (n_lin, P, P)  weight stack: layer_in, middle*, layer_out
       b_ref  : (n_lin, 1, P)  bias stack (last entry = fused out+genre bias)
       wg_ref : (d_out_p, P)   genre weight, columns pre-placed at [Y_OFF, ...)
       out_ref: (TB, P)        out_x in lanes [0,d_out), out_y at [Y_OFF, ...)"""
    n_lin = w_ref.shape[0]          # static: 1 (in) + num_middle + 1 (out)
    n_tanh = n_lin - 1
    d_in_p = x_ref.shape[1]
    wdt = w_ref.dtype               # fp32 or bf16 weight operands

    # Genre branch first: independent of the tanh chain, so for deep stacks
    # (fori_loop = basic-block boundary) its MXU push/drain hides behind the
    # first layers.  Tiny K=d_out matmul; output lanes already at [Y_OFF, ...).
    gen = jnp.dot(y_ref[...].astype(wdt), wg_ref[...],
                  preferred_element_type=jnp.float32)

    def layer(i, h):
        return jnp.tanh(
            jnp.dot(h.astype(wdt), w_ref[i],
                    preferred_element_type=jnp.float32) + b_ref[i])

    # Layer 0: slice the (zero-padded) weight rows down to the real d_in_p.
    w0 = w_ref[0][:d_in_p, :]
    h = jnp.tanh(jnp.dot(x_ref[...].astype(wdt), w0,
                         preferred_element_type=jnp.float32) + b_ref[0])

    if n_tanh <= 8:
        # shallow stacks: static unroll (full LLO scheduler visibility)
        for i in range(1, n_tanh):
            h = layer(i, h)
    else:
        # deep stacks: bound live ranges / code size
        h = jax.lax.fori_loop(1, n_tanh, layer, h)

    # Fused tail: layer_out matmul + genre accumulation + fused bias, one
    # lane-dense 128-wide unmasked store.
    out = (jnp.dot(h.astype(wdt), w_ref[n_tanh],
                   preferred_element_type=jnp.float32)
           + gen + b_ref[n_tanh])
    out_ref[...] = out.astype(out_ref.dtype)


# ---------------------------------------------------------------------------
# Packing (done once per set of weights)
# ---------------------------------------------------------------------------
def pack_params(w_in, b_in, w_hid, b_hid, w_out, b_out, w_gen, b_gen,
                *, use_bf16=False):
    """Returns (w_stack, b_stack, w_gen_pad):
         w_stack : (n_lin, P, P)     zero-padded weights (in, middle*, out)
         b_stack : (n_lin, 1, P)     biases; last entry fuses b_out & b_gen
         w_gen_pad: (d_out_p, P)     genre weight, cols placed at [Y_OFF, ...)"""
    d_in, d_hidden = w_in.shape
    d_out = w_out.shape[1]
    num_middle = w_hid.shape[0]
    assert d_in <= P and d_hidden <= P and d_out <= P
    assert d_out <= Y_OFF and Y_OFF + d_out <= P, \
        "dim_output must fit in lanes [Y_OFF, 128)"
    wdt = jnp.bfloat16 if use_bf16 else jnp.float32

    def pad_w(w):
        fi, fo = w.shape
        return jnp.zeros((P, P), jnp.float32).at[:fi, :fo].set(
            w.astype(jnp.float32))

    def pad_b(b):
        b = b.reshape(1, -1).astype(jnp.float32)
        return jnp.zeros((1, P), jnp.float32).at[:, :b.shape[1]].set(b)

    ws = [pad_w(w_in)]
    bs = [pad_b(b_in)]
    for l in range(num_middle):
        ws.append(pad_w(w_hid[l]))
        bs.append(pad_b(b_hid[l]))
    ws.append(pad_w(w_out))

    # Fused tail bias: layer_out bias at lanes [0,d_out), genre bias at
    # lanes [Y_OFF, Y_OFF+d_out).
    b_tail = jnp.zeros((1, P), jnp.float32)
    b_tail = b_tail.at[:, :d_out].set(b_out.reshape(1, -1).astype(jnp.float32))
    b_tail = b_tail.at[:, Y_OFF:Y_OFF + d_out].set(
        b_gen.reshape(1, -1).astype(jnp.float32))
    bs.append(b_tail)

    d_out_p = _ceil_to(d_out, 8)
    w_gen_pad = jnp.zeros((d_out_p, P), jnp.float32).at[
        :d_out, Y_OFF:Y_OFF + d_out].set(w_gen.astype(jnp.float32))

    # biases stay f32 regardless (tiny; exact bias add)
    return jnp.stack(ws).astype(wdt), jnp.stack(bs), w_gen_pad.astype(wdt)


# ---------------------------------------------------------------------------
# Wrapper (one jit: batch pad + kernel + output slices all fuse/dispatch once)
# ---------------------------------------------------------------------------
def _choose_tb(batch):
    b8 = _ceil_to(batch, 8)
    tb = min(1024, b8)            # big tiles: per-grid-step overhead amortized
    if b8 >= 16:
        # keep >= 2 grid steps so v7x's two TensorCores both get batch work
        tb = min(tb, _ceil_to(pl.cdiv(b8, 2), 8))
    return tb


@jax.jit
def nn_double_embedding_forward(x, y, w_stack, b_stack, w_gen_pad):
    B, d_in = x.shape
    d_out = y.shape[1]
    d_in_p = _ceil_to(d_in, 8)
    d_out_p = _ceil_to(d_out, 8)
    n_lin = w_stack.shape[0]

    TB = _choose_tb(B)
    b_pad = _ceil_to(B, TB)
    grid = (b_pad // TB,)

    x_p = jnp.pad(x.astype(jnp.float32), ((0, b_pad - B), (0, d_in_p - d_in)))
    y_p = jnp.pad(y.astype(jnp.float32), ((0, b_pad - B), (0, d_out_p - d_out)))

    w_bytes = int(w_stack.size) * w_stack.dtype.itemsize
    wg_bytes = int(w_gen_pad.size) * w_gen_pad.dtype.itemsize
    flops = 2 * b_pad * P * (d_in_p + (n_lin - 1) * P + d_out_p)
    transcendentals = b_pad * P * (n_lin - 1)
    bytes_accessed = int(x_p.size * 4 + y_p.size * 4 + w_bytes
                         + int(b_stack.size) * 4 + wg_bytes + b_pad * P * 4)

    out = pl.pallas_call(
        _double_embedding_kernel,
        out_shape=jax.ShapeDtypeStruct((b_pad, P), jnp.float32),
        grid_spec=pltpu.PrefetchScalarGridSpec(
            num_scalar_prefetch=0,
            grid=grid,
            in_specs=[
                pl.BlockSpec((TB, d_in_p), lambda i: (i, 0)),        # x (batch-tiled)
                pl.BlockSpec((TB, d_out_p), lambda i: (i, 0)),       # y (batch-tiled)
                pl.BlockSpec((n_lin, P, P), lambda i: (0, 0, 0)),    # weights (resident)
                pl.BlockSpec((n_lin, 1, P), lambda i: (0, 0, 0)),    # biases  (resident)
                pl.BlockSpec((d_out_p, P), lambda i: (0, 0)),        # genre W (resident)
            ],
            out_specs=pl.BlockSpec((TB, P), lambda i: (i, 0)),
        ),
        compiler_params=pltpu.CompilerParams(
            dimension_semantics=("parallel",)),
        cost_estimate=pl.CostEstimate(
            flops=flops,
            transcendentals=transcendentals,
            bytes_accessed=bytes_accessed),
    )(x_p, y_p, w_stack, b_stack, w_gen_pad)

    out_x = out[:B, :d_out]
    out_y = out[:B, Y_OFF:Y_OFF + d_out]
    return out_x, out_y


# ---------------------------------------------------------------------------
# Parameter init (mimics PyTorch nn.Linear default) and pure-JAX reference
# ---------------------------------------------------------------------------
def init_params(key, dim_input, dim_hidden, dim_output, n_layers):
    num_middle = n_layers - 1
    keys = jax.random.split(key, 8)

    def linear(kw, kb, fan_in, fan_out):
        bound = 1.0 / math.sqrt(fan_in)
        w = jax.random.uniform(kw, (fan_in, fan_out), jnp.float32, -bound, bound)
        b = jax.random.uniform(kb, (1, fan_out), jnp.float32, -bound, bound)
        return w, b

    w_in, b_in = linear(keys[0], keys[1], dim_input, dim_hidden)
    bound = 1.0 / math.sqrt(dim_hidden)
    w_hid = jax.random.uniform(
        keys[2], (num_middle, dim_hidden, dim_hidden), jnp.float32, -bound, bound)
    b_hid = jax.random.uniform(
        keys[3], (num_middle, 1, dim_hidden), jnp.float32, -bound, bound)
    w_out, b_out = linear(keys[4], keys[5], dim_hidden, dim_output)
    w_gen, b_gen = linear(keys[6], keys[7], dim_output, dim_output)
    return (w_in, b_in, w_hid, b_hid, w_out, b_out, w_gen, b_gen)


def reference_forward(x, y, params):
    (w_in, b_in, w_hid, b_hid, w_out, b_out, w_gen, b_gen) = params
    h = jnp.tanh(x @ w_in + b_in)
    for l in range(w_hid.shape[0]):
        h = jnp.tanh(h @ w_hid[l] + b_hid[l])
    return h @ w_out + b_out, y @ w_gen + b_gen


# ---------------------------------------------------------------------------
if __name__ == "__main__":
    # dim_input=16, dim_hidden=32, dim_output=8, n_layers=2 (one middle layer)
    B, D_IN, D_HID, D_OUT, N_LAYERS = 8, 16, 32, 8, 2

    key = jax.random.PRNGKey(0)
    k_x, k_y, k_p = jax.random.split(key, 3)
    x = jax.random.normal(k_x, (B, D_IN), dtype=jnp.float32)
    y = jax.random.normal(k_y, (B, D_OUT), dtype=jnp.float32)
    params = init_params(k_p, D_IN, D_HID, D_OUT, N_LAYERS)
    ref_x, ref_y = reference_forward(x, y, params)

    # --- fp32 weight path: matches the PyTorch-style reference to 1e-5 ------
    w_s, b_s, w_g = pack_params(*params, use_bf16=False)
    out_x, out_y = nn_double_embedding_forward(x, y, w_s, b_s, w_g)
    jax.block_until_ready((out_x, out_y))
    assert out_x.shape == (B, D_OUT) and out_y.shape == (B, D_OUT)
    assert jnp.allclose(out_x, ref_x, atol=1e-5, rtol=1e-5)
    assert jnp.allclose(out_y, ref_y, atol=1e-5, rtol=1e-5)

    # --- bf16 weight path (MXU lever on v5e/v7x): relaxed tolerance ---------
    w_s16, b_s16, w_g16 = pack_params(*params, use_bf16=True)
    out_x16, out_y16 = nn_double_embedding_forward(x, y, w_s16, b_s16, w_g16)
    jax.block_until_ready((out_x16, out_y16))
    assert jnp.allclose(out_x16, ref_x, atol=2e-2, rtol=2e-2)
    assert jnp.allclose(out_y16, ref_y, atol=2e-2, rtol=2e-2)

    print("KERNEL_OK")
</pallas_src>

<mosaic_0001>
module attributes {stable_mosaic.version = 11 : i64} {
  func.func @_double_embedding_kernel(%arg0: i32, %arg1: memref<8x16xf32, #tpu.memory_space<vmem>>, %arg2: memref<8x8xf32, #tpu.memory_space<vmem>>, %arg3: memref<3x128x128xf32, #tpu.memory_space<vmem>>, %arg4: memref<3x1x128xf32, #tpu.memory_space<vmem>>, %arg5: memref<8x128xf32, #tpu.memory_space<vmem>>, %arg6: memref<8x128xf32, #tpu.memory_space<vmem>>) attributes {dimension_semantics = [#tpu.dimension_semantics<parallel>], iteration_bounds = array<i64: 1>, scalar_prefetch = 0 : i64, scratch_operands = 0 : i64, tpu.core_type = #tpu.core_type<tc>, window_params = [{transform_indices = @transform_0, window_bounds = array<i64: 8, 16>}, {transform_indices = @transform_1, window_bounds = array<i64: 8, 8>}, {pipeline_mode = #tpu.pipeline_mode<synchronous>, transform_indices = @transform_2, window_bounds = array<i64: 3, 128, 128>}, {pipeline_mode = #tpu.pipeline_mode<synchronous>, transform_indices = @transform_3, window_bounds = array<i64: 3, 1, 128>}, {pipeline_mode = #tpu.pipeline_mode<synchronous>, transform_indices = @transform_4, window_bounds = array<i64: 8, 128>}, {transform_indices = @transform_5, window_bounds = array<i64: 8, 128>}]} {
    %c0 = arith.constant 0 : index
    %c0_0 = arith.constant 0 : index
    %0 = vector.load %arg2[%c0, %c0_0] : memref<8x8xf32, #tpu.memory_space<vmem>>, vector<8x8xf32>
    %c0_1 = arith.constant 0 : index
    %c0_2 = arith.constant 0 : index
    %1 = vector.load %arg5[%c0_1, %c0_2] : memref<8x128xf32, #tpu.memory_space<vmem>>, vector<8x128xf32>
    %cst = arith.constant dense<0.000000e+00> : vector<8x128xf32>
    %2 = tpu.matmul %0, %1, %cst {dimension_numbers = #tpu.dot_dimension_numbers<[1], [0], [0], [1], [0, 0, 1, 1], [], []>} : vector<8x8xf32>, vector<8x128xf32>, vector<8x128xf32> -> vector<8x128xf32>
    %c0_3 = arith.constant 0 : index
    %c0_4 = arith.constant 0 : index
    %c0_5 = arith.constant 0 : index
    %3 = vector.load %arg3[%c0_3, %c0_4, %c0_5] : memref<3x128x128xf32, #tpu.memory_space<vmem>>, vector<1x128x128xf32>
    %4 = vector.shape_cast %3 : vector<1x128x128xf32> to vector<128x128xf32>
    %5 = vector.extract_strided_slice %4 {offsets = [0, 0], sizes = [16, 128], strides = [1, 1]} : vector<128x128xf32> to vector<16x128xf32>
    %c0_6 = arith.constant 0 : index
    %c0_7 = arith.constant 0 : index
    %6 = vector.load %arg1[%c0_6, %c0_7] : memref<8x16xf32, #tpu.memory_space<vmem>>, vector<8x16xf32>
    %cst_8 = arith.constant dense<0.000000e+00> : vector<8x128xf32>
    %7 = tpu.matmul %6, %5, %cst_8 {dimension_numbers = #tpu.dot_dimension_numbers<[1], [0], [0], [1], [0, 0, 1, 1], [], []>} : vector<8x16xf32>, vector<16x128xf32>, vector<8x128xf32> -> vector<8x128xf32>
    %c0_9 = arith.constant 0 : index
    %c0_10 = arith.constant 0 : index
    %c0_11 = arith.constant 0 : index
    %8 = vector.load %arg4[%c0_9, %c0_10, %c0_11] : memref<3x1x128xf32, #tpu.memory_space<vmem>>, vector<1x1x128xf32>
    %9 = vector.shape_cast %8 : vector<1x1x128xf32> to vector<1x128xf32>
    %10 = vector.broadcast %9 : vector<1x128xf32> to vector<8x128xf32>
    %11 = arith.addf %7, %10 : vector<8x128xf32>
    %12 = math.tanh %11 : vector<8x128xf32>
    %c1 = arith.constant 1 : index
    %c0_12 = arith.constant 0 : index
    %c0_13 = arith.constant 0 : index
    %13 = vector.load %arg3[%c1, %c0_12, %c0_13] : memref<3x128x128xf32, #tpu.memory_space<vmem>>, vector<1x128x128xf32>
    %14 = vector.shape_cast %13 : vector<1x128x128xf32> to vector<128x128xf32>
    %cst_14 = arith.constant dense<0.000000e+00> : vector<8x128xf32>
    %15 = tpu.matmul %12, %14, %cst_14 {dimension_numbers = #tpu.dot_dimension_numbers<[1], [0], [0], [1], [0, 0, 1, 1], [], []>} : vector<8x128xf32>, vector<128x128xf32>, vector<8x128xf32> -> vector<8x128xf32>
    %c1_15 = arith.constant 1 : index
    %c0_16 = arith.constant 0 : index
    %c0_17 = arith.constant 0 : index
    %16 = vector.load %arg4[%c1_15, %c0_16, %c0_17] : memref<3x1x128xf32, #tpu.memory_space<vmem>>, vector<1x1x128xf32>
    %17 = vector.shape_cast %16 : vector<1x1x128xf32> to vector<1x128xf32>
    %18 = vector.broadcast %17 : vector<1x128xf32> to vector<8x128xf32>
    %19 = arith.addf %15, %18 : vector<8x128xf32>
    %20 = math.tanh %19 : vector<8x128xf32>
    %c2 = arith.constant 2 : index
    %c0_18 = arith.constant 0 : index
    %c0_19 = arith.constant 0 : index
    %21 = vector.load %arg3[%c2, %c0_18, %c0_19] : memref<3x128x128xf32, #tpu.memory_space<vmem>>, vector<1x128x128xf32>
    %22 = vector.shape_cast %21 : vector<1x128x128xf32> to vector<128x128xf32>
    %cst_20 = arith.constant dense<0.000000e+00> : vector<8x128xf32>
    %23 = tpu.matmul %20, %22, %cst_20 {dimension_numbers = #tpu.dot_dimension_numbers<[1], [0], [0], [1], [0, 0, 1, 1], [], []>} : vector<8x128xf32>, vector<128x128xf32>, vector<8x128xf32> -> vector<8x128xf32>
    %24 = arith.addf %23, %2 : vector<8x128xf32>
    %c2_21 = arith.constant 2 : index
    %c0_22 = arith.constant 0 : index
    %c0_23 = arith.constant 0 : index
    %25 = vector.load %arg4[%c2_21, %c0_22, %c0_23] : memref<3x1x128xf32, #tpu.memory_space<vmem>>, vector<1x1x128xf32>
    %26 = vector.shape_cast %25 : vector<1x1x128xf32> to vector<1x128xf32>
    %27 = vector.broadcast %26 : vector<1x128xf32> to vector<8x128xf32>
    %28 = arith.addf %24, %27 : vector<8x128xf32>
    %c0_24 = arith.constant 0 : index
    %c0_25 = arith.constant 0 : index
    %29 = vector.load %arg6[%c0_24, %c0_25] : memref<8x128xf32, #tpu.memory_space<vmem>>, vector<8x128xf32>
    tpu.vector_store %arg6[%c0_24, %c0_25], %28 {strides = array<i32>} : memref<8x128xf32, #tpu.memory_space<vmem>>, vector<8x128xf32>,
    return
  }
  func.func @transform_0(%arg0: i32) -> (i32, i32) {
    %c0_i32 = arith.constant 0 : i32
    %c0_i32_0 = arith.constant 0 : i32
    return %arg0, %c0_i32 : i32, i32
  }
  func.func @transform_1(%arg0: i32) -> (i32, i32) {
    %c0_i32 = arith.constant 0 : i32
    %c0_i32_0 = arith.constant 0 : i32
    return %arg0, %c0_i32 : i32, i32
  }
  func.func @transform_2(%arg0: i32) -> (i32, i32, i32) {
    %c0_i32 = arith.constant 0 : i32
    %c0_i32_0 = arith.constant 0 : i32
    %c0_i32_1 = arith.constant 0 : i32
    %c0_i32_2 = arith.constant 0 : i32
    return %c0_i32, %c0_i32_0, %c0_i32_1 : i32, i32, i32
  }
  func.func @transform_3(%arg0: i32) -> (i32, i32, i32) {
    %c0_i32 = arith.constant 0 : i32
    %c0_i32_0 = arith.constant 0 : i32
    %c0_i32_1 = arith.constant 0 : i32
    %c0_i32_2 = arith.constant 0 : i32
    return %c0_i32, %c0_i32_0, %c0_i32_1 : i32, i32, i32
  }
  func.func @transform_4(%arg0: i32) -> (i32, i32) {
    %c0_i32 = arith.constant 0 : i32
    %c0_i32_0 = arith.constant 0 : i32
    %c0_i32_1 = arith.constant 0 : i32
    return %c0_i32, %c0_i32_0 : i32, i32
  }
  func.func @transform_5(%arg0: i32) -> (i32, i32) {
    %c0_i32 = arith.constant 0 : i32
    %c0_i32_0 = arith.constant 0 : i32
    return %arg0, %c0_i32 : i32, i32
  }
}

</mosaic_0001>

<bundles_post_ra>
// kernel: nn_double_embedding_forward.1
= control target key start
LH: loop header
LB: loop body
LE: loop exit
PB: predicated region body
PF: predicated region fallthrough
CT: control target
= control target key end

     0   :  { %10 = vsyncpa [#allocation3], 0  ;;  %s761_s0 = inlined_call_operand.hbm [shape: f32[8,16], index: 0, kind: input, shape index: {}]   ;;  %s762_s1 = inlined_call_operand.hbm [shape: f32[8,8], index: 1, kind: input, shape index: {}]   ;;  %s763_s2 = inlined_call_operand.hbm [shape: f32[3,128,128], index: 2, kind: input, shape index: {}]   ;;  %s764_s3 = inlined_call_operand.vmem [shape: f32[3,1,128], index: 3, kind: input, shape index: {}]   ;;  %s765_s4 = inlined_call_operand.hbm [shape: f32[8,128], index: 4, kind: input, shape index: {}]   ;;  %s766_s5 = inlined_call_operand.vmem [shape: f32[8,128], index: 5, kind: output, shape index: {}]  }
   0x1   :  { %11 = vsyncpa [#allocation5], 0 }
   0x2   :  { %12 = vsyncpa [#allocation8], 0  ;;  %s656_s18 = smov [#allocation4]   ;;  %s657_s20 = smov [#allocation2]  }
   0x3   :  { %s29_s19 = sshll.u32 %s656_s18, 4  ;;  %s19_s21 = sshll.u32 %s657_s20, 4  ;;  %s30_s19 = int_to_ptr.vmem [resolvable:$true] %s29_s19  ;;  %s20_s21 = int_to_ptr.vmem [resolvable:$true] %s19_s21 }
   0x4   :  { %s578_s22 = scalar_lea.vmem %s30_s19, 128  ;;  %p583_p1 = scmp.lt.s32.totalorder %s30_s19, %s30_s19 }
   0x5   :  { %p579_p0 = scmp.ne.s32.totalorder %s30_s19, %s578_s22  ;;  %p584_p2 = scmp.lt.s32.totalorder %s578_s22, %s578_s22 }
   0x7   :  { %p585_p3 = por %p584_p2, %p583_p1 }
   0x9   :  { %p586_p4 = pnand %p585_p3, %p579_p0 }
   0xb   :  { %589 = shalt.err (!%p586_p4)
}
   0xc   :  { %32 = dma.hbm_to_vmem [thread:$0]  %s762_s1, 128, %s30_s19, [#allocation5]  }
   0xd   :  { %s598_s25 = scalar_lea.vmem %s20_s21, 128  ;;  %p603_p6 = scmp.lt.s32.totalorder %s20_s21, %s20_s21 }
   0xe   :  { %p599_p5 = scmp.ne.s32.totalorder %s20_s21, %s598_s25  ;;  %p604_p7 = scmp.lt.s32.totalorder %s598_s25, %s598_s25 }
  0x10   :  { %p605_p8 = por %p604_p7, %p603_p6 }
  0x12   :  { %p606_p9 = pnand %p605_p8, %p599_p5 }
  0x14   :  { %609 = shalt.err (!%p606_p9)
}
  0x15   :  { %22 = dma.hbm_to_vmem [thread:$0]  %s761_s0, 128, %s20_s21, [#allocation3]  }
  0x16   :  { %s658_s28 = smov [#allocation6]  }
  0x17   :  { %s38_s29 = sshll.u32 %s658_s28, 4  ;;  %s39_s29 = int_to_ptr.vmem [resolvable:$true] %s38_s29 }
  0x18   :  { %s618_s30 = scalar_lea.vmem %s39_s29, 6144  ;;  %p623_p11 = scmp.lt.s32.totalorder %s39_s29, %s39_s29 }
  0x19   :  { %p619_p10 = scmp.ne.s32.totalorder %s39_s29, %s618_s30  ;;  %p624_p12 = scmp.lt.s32.totalorder %s618_s30, %s618_s30 }
  0x1b   :  { %p625_p13 = por %p624_p12, %p623_p11 }
  0x1d   :  { %p626_p0 = pnand %p625_p13, %p619_p10 }
  0x1f   :  { %629 = shalt.err (!%p626_p0)
}
  0x20   :  { %s659_s1 = smov 128   ;;  %s660_s6 = smov 8  }
  0x21   :  { %44 = dma.hbm_to_vmem [thread:$0]  %s763_s2, 6144, %s39_s29, [#allocation5], %s659_s1, %s659_s1, %s660_s6  }
  0x22   :  { %s661_s9 = smov [#allocation7]  }
  0x23   :  { %s53_s10 = sshll.u32 %s661_s9, 4  ;;  %s54_s10 = int_to_ptr.vmem [resolvable:$true] %s53_s10 }
  0x24   :  { %s638_s0 = scalar_lea.vmem %s54_s10, 128  ;;  %p643_p2 = scmp.lt.s32.totalorder %s54_s10, %s54_s10 }
  0x25   :  { %p639_p1 = scmp.ne.s32.totalorder %s54_s10, %s638_s0  ;;  %p644_p3 = scmp.lt.s32.totalorder %s638_s0, %s638_s0 }
  0x27   :  { %p645_p4 = por %p644_p3, %p643_p2 }
  0x29   :  { %p646_p5 = pnand %p645_p4, %p639_p1 }
  0x2b   :  { %649 = shalt.err (!%p646_p5)
}
  0x2c   :  { %56 = dma.hbm_to_vmem [thread:$0]  %s765_s4, 128, %s54_s10, [#allocation8]  }
  0x2d   :  { %650 = dma.done.wait [#allocation3], 128  }
  0x2e   :  { %651 = vsyncadd [#allocation3], 4294967168 }
  0x2f   :  { %652 = dma.done.wait [#allocation5], 6272  }
  0x30   :  { %653 = vsyncadd [#allocation5], 4294961024 }
  0x31   :  { %654 = dma.done.wait [#allocation8], 128  }
  0x32   :  { %655 = vsyncadd [#allocation8], 4294967168  ;;  %v662_v0 = vmov 0.0   ;;  %vm663_vm0 = vmmov 0   ;;  %v146_v1 = vld [vmem:[#allocation6 + $0x8] sm:$0xff]  ;;  %v145_v2 = vld [vmem:[#allocation6] sm:$0xff] }
  0x33   :  { %481 = vmatprep.subr.mxu1 %v662_v0  ;;  %485 = vmatprep.mubr.msk.f32.mxu1 %vm663_vm0, %v662_v0  ;;  %vm71_vm1 = vcmask 64512   ;;  %v147_v3 = vld [vmem:[#allocation2] sm:$0xff]  ;;  %vm155_vm2 = vcmask 130048   ;;  %v70_v4 = vld [vmem:[#allocation7] sm:$0xff]  ;;  %v69_v5 = vld [vmem:[#allocation4] sm:$0xff] }
  0x34   :  { %476 = vmatprep.subr.mxu0 %v662_v0  ;;  %478 = vmatprep.mubr.msk.f32.mxu0 %vm663_vm0, %v662_v0  ;;  %v246_v6 = vld [vmem:[#allocation6 + $0xf8] sm:$0xff]  ;;  %v245_v7 = vld [vmem:[#allocation6 + $0xf0] sm:$0xff]  ;;  %v244_v8 = vld [vmem:[#allocation6 + $0xe8] sm:$0xff] }
  0x35   :  { %482 = vmatpush3.msra.mxu1 %v146_v1  ;;  %477 = vmatpush3.msra.mxu0 %v70_v4  ;;  %v243_v9 = vld [vmem:[#allocation6 + $0xe0] sm:$0xff]  ;;  %v242_v10 = vld [vmem:[#allocation6 + $0xd8] sm:$0xff]  ;;  %v241_v11 = vld [vmem:[#allocation6 + $0xd0] sm:$0xff] }
  0x36   :  { %483 = vmatprep.subr.mxu1 %v662_v0  ;;  %479 = vmatmul.mubr.msk.f32.vlgmr.msra.gmra.mxu0 %vm71_vm1, %v69_v5  ;;  %v240_v12 = vld [vmem:[#allocation6 + $0xc8] sm:$0xff]  ;;  %v239_v13 = vld [vmem:[#allocation6 + $0xc0] sm:$0xff]  ;;  %v238_v14 = vld [vmem:[#allocation6 + $0xb8] sm:$0xff] }
  0x37   :  { %484 = vmatpush3.msra.mxu1 %v145_v2  ;;  %488 = vmatprep.subr.mxu0 %v662_v0  ;;  %v237_v15 = vld [vmem:[#allocation6 + $0xb0] sm:$0xff]  ;;  %v236_v16 = vld [vmem:[#allocation6 + $0xa8] sm:$0xff]  ;;  %v235_v17 = vld [vmem:[#allocation6 + $0xa0] sm:$0xff] }
  0x38   :  { %486 = vmatmul.mubr.msk.f32.vlgmr.msra.gmra.mxu1 %vm155_vm2, %v147_v3  ;;  %489 = vmatpush3.msra.mxu0 %v246_v6  ;;  %v234_v18 = vld [vmem:[#allocation6 + $0x98] sm:$0xff]  ;;  %v233_v19 = vld [vmem:[#allocation6 + $0x90] sm:$0xff]  ;;  %v232_v20 = vld [vmem:[#allocation6 + $0x88] sm:$0xff] }
  0x39   :  { %520 = vmatprep.mubr.msk.f32.mxu0 %vm663_vm0, %v662_v0  ;;  %490 = vmatprep.subr.mxu0 %v662_v0  ;;  %v231_v21 = vld [vmem:[#allocation6 + $0x80] sm:$0xff]  ;;  %v342_v22 = vld [vmem:[#allocation6 + $0x178] sm:$0xff]  ;;  %v341_v23 = vld [vmem:[#allocation6 + $0x170] sm:$0xff] }
  0x3a   :  { %523 = vmatprep.subr.mxu1 %v662_v0  ;;  %491 = vmatpush3.msra.mxu0 %v245_v7  ;;  %v340_v24 = vld [vmem:[#allocation6 + $0x168] sm:$0xff]  ;;  %v339_v25 = vld [vmem:[#allocation6 + $0x160] sm:$0xff]  ;;  %v338_v26 = vld [vmem:[#allocation6 + $0x158] sm:$0xff] }
  0x3b   :  { %555 = vmatprep.mubr.msk.f32.mxu1 %vm663_vm0, %v662_v0  ;;  %492 = vmatprep.subr.mxu0 %v662_v0  ;;  %v337_v27 = vld [vmem:[#allocation6 + $0x150] sm:$0xff]  ;;  %v336_v28 = vld [vmem:[#allocation6 + $0x148] sm:$0xff]  ;;  %v335_v36 = vld [vmem:[#allocation6 + $0x140] sm:$0xff] }
  0x3c   :  { %493 = vmatpush3.msra.mxu0 %v244_v8  ;;  %524 = vmatpush3.msra.mxu1 %v342_v22  ;;  %v431_v29 = vld [vmem:[%s764_s3] ss:$0 sm:$0xff]  ;;  %v334_v37 = vld [vmem:[#allocation6 + $0x138] sm:$0xff]  ;;  %v332_v39 = vld [vmem:[#allocation6 + $0x128] sm:$0xff] }
  0x3d   :  { %494 = vmatprep.subr.mxu0 %v662_v0  ;;  %525 = vmatprep.subr.mxu1 %v662_v0  ;;  %v333_v38 = vld [vmem:[#allocation6 + $0x130] sm:$0xff]  ;;  %v331_v40 = vld [vmem:[#allocation6 + $0x120] sm:$0xff]  ;;  %v330_v41 = vld [vmem:[#allocation6 + $0x118] sm:$0xff] }
  0x3e   :  { %495 = vmatpush3.msra.mxu0 %v243_v9  ;;  %526 = vmatpush3.msra.mxu1 %v341_v23  ;;  %v329_v42 = vld [vmem:[#allocation6 + $0x110] sm:$0xff]  ;;  %v328_v43 = vld [vmem:[#allocation6 + $0x108] sm:$0xff]  ;;  %v327_v44 = vld [vmem:[#allocation6 + $0x100] sm:$0xff] }
  0x3f   :  { %496 = vmatprep.subr.mxu0 %v662_v0  ;;  %527 = vmatprep.subr.mxu1 %v662_v0  ;;  %v434_v45 = vld [vmem:[%s764_s3 + $0x1] ss:$0 sm:$0xff]  ;;  %v436_v51 = vld [vmem:[%s764_s3 + $0x2] ss:$0 sm:$0xff] }
  0x40   :  { %497 = vmatpush3.msra.mxu0 %v242_v10  ;;  %528 = vmatpush3.msra.mxu1 %v340_v24 }
  0x41   :  { %498 = vmatprep.subr.mxu0 %v662_v0  ;;  %529 = vmatprep.subr.mxu1 %v662_v0 }
  0x42   :  { %499 = vmatpush3.msra.mxu0 %v241_v11  ;;  %530 = vmatpush3.msra.mxu1 %v339_v25 }
  0x43   :  { %500 = vmatprep.subr.mxu0 %v662_v0  ;;  %531 = vmatprep.subr.mxu1 %v662_v0 }
  0x44   :  { %501 = vmatpush3.msra.mxu0 %v240_v12  ;;  %532 = vmatpush3.msra.mxu1 %v338_v26 }
  0x45   :  { %502 = vmatprep.subr.mxu0 %v662_v0  ;;  %533 = vmatprep.subr.mxu1 %v662_v0 }
  0x46   :  { %503 = vmatpush3.msra.mxu0 %v239_v13  ;;  %534 = vmatpush3.msra.mxu1 %v337_v27 }
  0x47   :  { %504 = vmatprep.subr.mxu0 %v662_v0  ;;  %535 = vmatprep.subr.mxu1 %v662_v0 }
  0x48   :  { %505 = vmatpush3.msra.mxu0 %v238_v14  ;;  %536 = vmatpush3.msra.mxu1 %v336_v28 }
  0x49   :  { %506 = vmatprep.subr.mxu0 %v662_v0  ;;  %537 = vmatprep.subr.mxu1 %v662_v0 }
  0x4a   :  { %507 = vmatpush3.msra.mxu0 %v237_v15  ;;  %538 = vmatpush3.msra.mxu1 %v335_v36 }
  0x4b   :  { %508 = vmatprep.subr.mxu0 %v662_v0  ;;  %539 = vmatprep.subr.mxu1 %v662_v0 }
  0x4c   :  { %509 = vmatpush3.msra.mxu0 %v236_v16  ;;  %540 = vmatpush3.msra.mxu1 %v334_v37 }
  0x4d   :  { %510 = vmatprep.subr.mxu0 %v662_v0  ;;  %541 = vmatprep.subr.mxu1 %v662_v0 }
  0x4e   :  { %511 = vmatpush3.msra.mxu0 %v235_v17  ;;  %542 = vmatpush3.msra.mxu1 %v333_v38 }
  0x4f   :  { %512 = vmatprep.subr.mxu0 %v662_v0  ;;  %543 = vmatprep.subr.mxu1 %v662_v0 }
  0x50   :  { %513 = vmatpush3.msra.mxu0 %v234_v18  ;;  %544 = vmatpush3.msra.mxu1 %v332_v39 }
  0x51   :  { %514 = vmatprep.subr.mxu0 %v662_v0  ;;  %545 = vmatprep.subr.mxu1 %v662_v0 }
  0x52   :  { %515 = vmatpush3.msra.mxu0 %v233_v19  ;;  %546 = vmatpush3.msra.mxu1 %v331_v40 }
  0x53   :  { %516 = vmatprep.subr.mxu0 %v662_v0  ;;  %547 = vmatprep.subr.mxu1 %v662_v0 }
  0x54   :  { %517 = vmatpush3.msra.mxu0 %v232_v20  ;;  %548 = vmatpush3.msra.mxu1 %v330_v41 }
  0x55   :  { %518 = vmatprep.subr.mxu0 %v662_v0  ;;  %549 = vmatprep.subr.mxu1 %v662_v0 }
  0x56   :  { %519 = vmatpush3.msra.mxu0 %v231_v21  ;;  %550 = vmatpush3.msra.mxu1 %v329_v42 }
  0x57   :  { %551 = vmatprep.subr.mxu1 %v662_v0 }
  0x58   :  { %552 = vmatpush3.msra.mxu1 %v328_v43 }
  0x59   :  { %553 = vmatprep.subr.mxu1 %v662_v0 }
  0x5a   :  { %554 = vmatpush3.msra.mxu1 %v327_v44 }
  0xf6   :  { %v141_v30 = vpop.f32.mrf.mxu0 }
  0xf8   :  { %v225_v31 = vpop.f32.mrf.mxu1  ;;  %v480_v33 = vpop.f32.mrf.mxu0 }
  0xf9   :  { %v226_v32 = vadd.f32 %v431_v29, %v225_v31 }
  0xfa   :  { %v487_v34 = vpop.f32.mrf.mxu1 }
  0xfb   :  { %566 = vtanh.f32 %v226_v32 }
 0x108   :  { %v567_v35 = vpop.eup %566 }
 0x109   :  { %521 = vmatmul.mubr.f32.vlgmr.msra.gmra.mxu0 %v567_v35 }
 0x1c9   :  { %v321_v46 = vpop.f32.mrf.mxu0 }
 0x1ca   :  { %v322_v47 = vadd.f32 %v434_v45, %v321_v46 }
 0x1cb   :  { %v522_v48 = vpop.f32.mrf.mxu0 }
 0x1cc   :  { %568 = vtanh.f32 %v322_v47 }
 0x1d9   :  { %v569_v49 = vpop.eup %568 }
 0x1da   :  { %556 = vmatmul.mubr.f32.vlgmr.msra.gmra.mxu1 %v569_v49 }
 0x29a   :  { %v409_v50 = vpop.f32.mrf.mxu1 }
 0x29b   :  { %v410_v52 = vadd.f32 %v409_v50, %v141_v30 }
 0x29c   :  { %v557_v53 = vpop.f32.mrf.mxu1 }
 0x29d   :  { %v421_v54 = vadd.f32 %v436_v51, %v410_v52 }
 0x29f   :  { %422 = vst [vmem:[%s766_s5] sm:$0xff] %v421_v54 }
 0x2a0   :  { %427 = vsyncpa [#allocation3], 1 }
 0x2a1   :  { %428 = vsyncpa [#allocation5], 1 }
 0x2a2   :  { %429 = vsyncpa [#allocation8], 1 }

</bundles_post_ra>
